<compile_context>
chip_gen: v5e
topology: v5e:2x2
jax: 0.10.0
libtpu: 0.0.40
codegen_flags: <defaults>
</compile_context>

<pallas_src>
import jax
import jax.numpy as jnp
from jax.experimental import pallas as pl
from jax.experimental.pallas import tpu as pltpu

_LANE = 128
_SUBLANE = 8
# ~6 MiB (f32-equivalent) per block buffer: large enough to amortize grid-step
# overhead, small enough that the double-buffered footprint (+ upcast temps)
# stays well under v7x's 64 MiB per-TensorCore VMEM.
_TARGET_BLOCK_BYTES_F32 = 6 * 1024 * 1024
_VMEM_CAP_BYTES = 48 * 1024 * 1024
_LANE_CHOICES = (2048, 1024, 512, 256, 128)


def _softplus_kernel(x_ref, o_ref):
    # Load in native dtype, compute in f32 in-register, store native dtype.
    # TODO(synk): on v7x, profile whether the 2 f32 transcendentals/element
    # make the EUP slot the bottleneck for bf16 streams at 3.2 TB/s; if so,
    # compute exp/log1p in bf16 there (f32 compute is mandatory on v5e).
    x = x_ref[...].astype(jnp.float32)
    y = jnp.maximum(x, 0.0) + jnp.log1p(jnp.exp(-jnp.abs(x)))
    o_ref[...] = y.astype(o_ref.dtype)


def _softplus_2d(x2d):
    """Elementwise softplus over a (rows, c) slab via a streaming Pallas kernel."""
    rows, c = x2d.shape
    dtype = x2d.dtype
    elem_bytes = jnp.dtype(dtype).itemsize

    # Row block sized against f32-equivalent bytes (the in-kernel upcast is
    # what actually lives on-chip), rounded down to a sublane multiple.
    blk_rows_target = max(
        _SUBLANE, (_TARGET_BLOCK_BYTES_F32 // (c * 4)) // _SUBLANE * _SUBLANE
    )

    if rows <= blk_rows_target:
        # Single block covering all rows (block dim == full array dim is OK
        # even when rows is not a multiple of 8).
        row_blk = rows
        grid_rows = 1
    else:
        # Keep blocks large, but guarantee >= ~4 grid steps so the "parallel"
        # axis can actually be split across v7x's two TensorCores.
        quarter = max(_SUBLANE, (rows // 4) // _SUBLANE * _SUBLANE)
        row_blk = min(blk_rows_target, quarter)
        grid_rows = pl.cdiv(rows, row_blk)

    blk_native = row_blk * c * elem_bytes
    blk_f32 = row_blk * c * 4
    # 2x double-buffered input + 2x output (native dtype) + ~2 f32 upcast
    # temporaries + headroom; clamped under v7x's 64 MiB physical VMEM.
    vmem_limit = int(
        min(
            _VMEM_CAP_BYTES,
            max(32 * 1024 * 1024, 4 * blk_native + 2 * blk_f32 + 4 * 1024 * 1024),
        )
    )

    n_elems = rows * c
    cost = pl.CostEstimate(
        flops=4 * n_elems,
        transcendentals=2 * n_elems,
        bytes_accessed=2 * n_elems * elem_bytes,
    )

    return pl.pallas_call(
        _softplus_kernel,
        out_shape=jax.ShapeDtypeStruct((rows, c), dtype),
        grid=(grid_rows,),
        in_specs=[pl.BlockSpec((row_blk, c), lambda i: (i, 0))],
        out_specs=pl.BlockSpec((row_blk, c), lambda i: (i, 0)),
        compiler_params=pltpu.CompilerParams(
            dimension_semantics=("parallel",),
            vmem_limit_bytes=vmem_limit,
        ),
        cost_estimate=cost,
    )(x2d)


def _pick_dividing_lane_width(n):
    """Widest lane width (multiple of 128) that divides n, else None."""
    for cand in _LANE_CHOICES:
        if n % cand == 0:
            return cand
    return None


def transform_module_forward(x):
    """Pallas equivalent of TransformModule(SoftplusTransform()).forward(x).

    Works for any shape / float dtype; elementwise softplus.
    """
    orig_shape = x.shape
    n = x.size
    if n == 0:
        return x
    x_flat = jnp.reshape(x, (-1,))

    c = _pick_dividing_lane_width(n)
    if c is not None:
        # Common case: free reshape to a lane-dense 2-D slab; exactly one HBM
        # read + one HBM write, no padding or slicing.
        out2d = _softplus_2d(jnp.reshape(x_flat, (n // c, c)))
        return jnp.reshape(out2d, orig_shape)

    # Ragged case: element count not a multiple of 128.  Run the aligned bulk
    # through the kernel and the small (< c)-element tail through plain JAX,
    # instead of materializing a padded copy of the input / slicing the output.
    c = _LANE
    for cand in _LANE_CHOICES:
        if n >= cand:
            c = cand
            break
    n_bulk = (n // c) * c
    if n_bulk == 0:
        # Fewer than 128 elements: not worth a kernel launch.
        return jax.nn.softplus(x)
    bulk = _softplus_2d(jnp.reshape(x_flat[:n_bulk], (n_bulk // c, c)))
    tail = jax.nn.softplus(x_flat[n_bulk:])
    out_flat = jnp.concatenate([jnp.reshape(bulk, (-1,)), tail])
    return jnp.reshape(out_flat, orig_shape)


if __name__ == "__main__":
    key = jax.random.PRNGKey(0)
    # Small NCHW input consistent with the module's generic forward.
    x = jax.random.normal(key, (2, 4, 16, 16), dtype=jnp.float32)

    y = jax.block_until_ready(transform_module_forward(x))

    # Reference check against plain-JAX softplus (same math as torch's
    # SoftplusTransform.__call__).
    y_ref = jax.nn.softplus(x)
    assert y.shape == x.shape and y.dtype == x.dtype
    assert float(jnp.max(jnp.abs(y - y_ref))) < 1e-5

    # Ragged (non-multiple-of-128) shape exercises the bulk + tail path.
    x2 = jax.random.normal(jax.random.PRNGKey(1), (7, 37), dtype=jnp.float32)
    y2 = jax.block_until_ready(transform_module_forward(x2))
    assert y2.shape == x2.shape and y2.dtype == x2.dtype
    assert float(jnp.max(jnp.abs(y2 - jax.nn.softplus(x2)))) < 1e-5

    print("KERNEL_OK")
</pallas_src>

<mosaic_0001>
module attributes {stable_mosaic.version = 11 : i64} {
  func.func @_softplus_kernel(%arg0: i32, %arg1: memref<1x2048xf32, #tpu.memory_space<vmem>>, %arg2: memref<1x2048xf32, #tpu.memory_space<vmem>>) attributes {dimension_semantics = [#tpu.dimension_semantics<parallel>], iteration_bounds = array<i64: 1>, scalar_prefetch = 0 : i64, scratch_operands = 0 : i64, tpu.core_type = #tpu.core_type<tc>, window_params = [{transform_indices = @transform_0, window_bounds = array<i64: 1, 2048>}, {transform_indices = @transform_1, window_bounds = array<i64: 1, 2048>}]} {
    %c0 = arith.constant 0 : index
    %c0_0 = arith.constant 0 : index
    %0 = vector.load %arg1[%c0, %c0_0] : memref<1x2048xf32, #tpu.memory_space<vmem>>, vector<1x2048xf32>
    %cst = arith.constant 0.000000e+00 : f32
    %1 = vector.broadcast %cst : f32 to vector<1x2048xf32>
    %2 = arith.maximumf %0, %1 : vector<1x2048xf32>
    %3 = math.absf %0 : vector<1x2048xf32>
    %cst_1 = arith.constant 0.000000e+00 : f32
    %4 = vector.broadcast %cst_1 : f32 to vector<1x2048xf32>
    %5 = arith.subf %4, %3 : vector<1x2048xf32>
    %6 = math.exp %5 : vector<1x2048xf32>
    %7 = math.log1p %6 : vector<1x2048xf32>
    %8 = arith.addf %2, %7 : vector<1x2048xf32>
    %c0_2 = arith.constant 0 : index
    %c0_3 = arith.constant 0 : index
    %9 = vector.load %arg2[%c0_2, %c0_3] : memref<1x2048xf32, #tpu.memory_space<vmem>>, vector<1x2048xf32>
    tpu.vector_store %arg2[%c0_2, %c0_3], %8 {strides = array<i32>} : memref<1x2048xf32, #tpu.memory_space<vmem>>, vector<1x2048xf32>,
    return
  }
  func.func @transform_0(%arg0: i32) -> (i32, i32) {
    %c0_i32 = arith.constant 0 : i32
    %c0_i32_0 = arith.constant 0 : i32
    return %arg0, %c0_i32 : i32, i32
  }
  func.func @transform_1(%arg0: i32) -> (i32, i32) {
    %c0_i32 = arith.constant 0 : i32
    %c0_i32_0 = arith.constant 0 : i32
    return %arg0, %c0_i32 : i32, i32
  }
}

</mosaic_0001>

<bundles_post_ra>
// kernel: tpu_custom_call.1
= control target key start
LH: loop header
LB: loop body
LE: loop exit
PB: predicated region body
PF: predicated region fallthrough
CT: control target
= control target key end

     0   :  { %6 = vsyncpa [#allocation3], 0  ;;  %s154_s0 = inlined_call_operand.hbm [shape: f32[1,2048], index: 0, kind: input, shape index: {}]   ;;  %s155_s1 = inlined_call_operand.hbm [shape: f32[1,2048], index: 1, kind: output, shape index: {}]  }
   0x1   :  { %7 = vsyncpa [#allocation4], 0  ;;  %s13_s8 = sshll.u32 %s154_s0, 4  ;;  %s136_s9 = smov [#allocation2]   ;;  %s14_s8 = int_to_ptr.hbm [resolvable:$true] %s13_s8 }
   0x2   :  { %s15_s10 = sshll.u32 %s136_s9, 4  ;;  %s16_s10 = int_to_ptr.vmem [resolvable:$true] %s15_s10 }
   0x3   :  { %18 = dma.hbm_to_vmem [thread:$0]  %s14_s8, 256, %s16_s10, [#allocation3]  }
   0x4   :  { %132 = dma.done.wait [#allocation3], 256  }
   0x5   :  { %133 = vsyncadd [#allocation3], 4294967040  ;;  %v23_v0 = vld [vmem:[#allocation2] sm:$0xff]  ;;  %v24_v1 = vld [vmem:[#allocation2 + $0x8] sm:$0xff]  ;;  %s137_s0 = smov [#allocation5]   ;;  %s64_s14 = sshll.u32 %s155_s1, 4  ;;  %s65_s14 = int_to_ptr.hbm [resolvable:$true] %s64_s14 }
   0x6   :  { %v27_v2 = vand.u32 2147483647, %v23_v0  ;;  %v28_v3 = vand.u32 2147483647, %v24_v1  ;;  %v25_v20 = vmax.f32 %v23_v0, 0.0  ;;  %v26_v24 = vmax.f32 %v24_v1, 0.0 }
   0x7   :  { %s62_s11 = sshll.u32 %s137_s0, 4  ;;  %s63_s11 = int_to_ptr.vmem [resolvable:$true] %s62_s11 }
   0x8   :  { %v29_v4 = vsub.f32 0.0, %v27_v2  ;;  %v30_v5 = vsub.f32 0.0, %v28_v3 }
   0xa   :  { %v31_v6 = vmul.f32 1.442695, %v29_v4  ;;  %v33_v7 = vmul.f32 1.442695, %v30_v5 }
   0xc   :  { %76 = vpow2.f32 %v31_v6 }
   0xd   :  { %78 = vpow2.f32 %v33_v7 }
  0x12   :  { %v77_v8 = vpop.eup %76 }
  0x13   :  { %v79_v9 = vpop.eup %78  ;;  %v35_v10 = vadd.f32 1.0, %v77_v8  ;;  %v38_v11 = vmul.f32 -0.5, %v77_v8  ;;  %v41_v15 = vand.u32 2147483647, %v77_v8 }
  0x14   :  { %v44_v12 = vadd.f32 1.0, %v79_v9  ;;  %v47_v13 = vmul.f32 -0.5, %v79_v9  ;;  %v50_v17 = vand.u32 2147483647, %v79_v9 }
  0x15   :  { %80 = vlog2.f32 %v35_v10  ;;  %v39_v14 = vadd.f32 1.0, %v38_v11  ;;  %vm42_vm0 = vcmp.lt.f32.partialorder %v41_v15, 0.0004427343 }
  0x16   :  { %82 = vlog2.f32 %v44_v12  ;;  %v48_v16 = vadd.f32 1.0, %v47_v13  ;;  %vm51_vm1 = vcmp.lt.f32.partialorder %v50_v17, 0.0004427343 }
  0x17   :  { %v40_v18 = vmul.f32 %v77_v8, %v39_v14 }
  0x18   :  { %v49_v21 = vmul.f32 %v79_v9, %v48_v16 }
  0x1b   :  { %v81_v19 = vpop.eup %80 }
  0x1c   :  { %v83_v22 = vpop.eup %82  ;;  %v37_v23 = vmul.f32 0.6931472, %v81_v19 }
  0x1d   :  { %v46_v25 = vmul.f32 0.6931472, %v83_v22 }
  0x1e   :  { %v43_v26 = vsel %vm42_vm0, %v40_v18, %v37_v23 }
  0x1f   :  { %v53_v27 = vadd.f32 %v43_v26, %v25_v20  ;;  %v52_v28 = vsel %vm51_vm1, %v49_v21, %v46_v25 }
  0x20   :  { %v54_v29 = vadd.f32 %v52_v28, %v26_v24 }
  0x21   :  { %55 = vst [vmem:[#allocation5] sm:$0xff] %v53_v27 }
  0x22   :  { %56 = vst [vmem:[#allocation5 + $0x8] sm:$0xff] %v54_v29 }
  0x23   :  { %67 = dma.vmem_to_hbm [thread:$0]  %s63_s11, 256, %s65_s14, [#allocation4]  }
  0x24   :  { %134 = dma.done.wait [#allocation4], 256  }
  0x25   :  { %135 = vsyncadd [#allocation4], 4294967040 }
  0x26   :  { %72 = vsyncpa [#allocation3], 1 }
  0x27   :  { %73 = vsyncpa [#allocation4], 1 }

</bundles_post_ra>
